<compile_context>
chip_gen: v7x
topology: tpu7x:2x2x1
jax: 0.10.0
libtpu: 0.0.40
codegen_flags: <defaults>
</compile_context>

<pallas_src>
import functools

import numpy as np
import jax
import jax.numpy as jnp
from jax.experimental import pallas as pl
from jax.experimental.pallas import tpu as pltpu


def _round_up(x, m):
    return ((x + m - 1) // m) * m


def _ber_kernel(tre_ref, tim_ref, pre_ref, pim_ref, g_ref, out_ref, *,
                w_pulse, decision_level, tile_b, batch):
    """Decode one batch tile of targets & preds, threshold, count mismatches.

    tre/tim/pre/pim: [tile_b, Td] f32  (targets / preds, real / imag planes)
    g_ref          : [Td, n_pad] f32   (static gather + trapezoid matrix)
    out_ref        : [1, n_pad] f32    (per-column mismatch count of this tile)
    """

    def decoded_power(re_ref, im_ref):
        # |u + u_shifted|^2 for one z-plane.
        #   u_shifted[k] = u[k + w_pulse] for k < Td - w_pulse, else 0.
        # The zero tail of the shifted slice IS the upper-bound mask, and the
        # lower bounds (k >= start_pulse on u and the shift) are dropped
        # because G's rows below start_pulse are all zero (asserted on host):
        # those lanes contribute exact 0 to the quadrature matmul.
        def tot(ref):
            x = ref[...]
            sh = jnp.concatenate(
                [x[:, w_pulse:], jnp.zeros((tile_b, w_pulse), x.dtype)],
                axis=1)
            return x + sh

        tr = tot(re_ref)
        ti = tot(im_ref)
        return tr * tr + ti * ti

    g = g_ref[...]
    # Per-pulse trapezoidal integration == one MXU matmul per z-plane.
    bits_t = jnp.dot(decoded_power(tre_ref, tim_ref), g,
                     preferred_element_type=jnp.float32) > decision_level
    bits_p = jnp.dot(decoded_power(pre_ref, pim_ref), g,
                     preferred_element_type=jnp.float32) > decision_level
    mism = bits_t != bits_p                                  # [tile_b, n_pad]

    if batch % tile_b != 0:
        # Partial trailing block: rows >= batch hold stale VMEM -> mask them.
        row = (pl.program_id(0) * tile_b
               + jax.lax.broadcasted_iota(jnp.int32, (tile_b, 1), 0))
        mism = jnp.logical_and(mism, row < batch)

    # Lane-dense per-tile partial sum; final scalar reduction happens in XLA.
    # (Padded n columns integrate to 0 on both planes -> never mismatch.)
    out_ref[...] = jnp.sum(mism.astype(jnp.float32), axis=0, keepdims=True)


class BEREstimaterPallas:
    """JAX/Pallas port of models.metrics.BEREstimater (forward pass only)."""

    def __init__(self, decision_level, pulse_number, pulse_width, t, t_window,
                 tile_b=512, vmem_limit_bytes=32 * 1024 * 1024):
        # tile_b = batch rows per grid step (must be a multiple of 8).
        # Per-generation guidance:
        #   v7x : keep tile_b <= 512-1024 (64 MiB physical VMEM, 2 TCs split
        #         tiles via the "parallel" grid axis).
        #   v6e : tile_b 1024-2048 for large B is fine (128 MiB VMEM); raise
        #         vmem_limit_bytes to ~64-96 MiB accordingly.
        #   v5e : tile_b 256-512; the 32 MiB limit below already lifts the
        #         16 MiB scoped default.
        # TODO(synk): optional pipeline_mode=pl.Buffered(3) on the signal
        # in_specs for v5e if DMA is still exposed (left off to stay on the
        # proven default double-buffer lowering path).
        self.decision_level = float(decision_level)
        self.pulse_number = int(pulse_number)
        self.pulse_width = float(pulse_width)
        self.t = np.asarray(t, dtype=np.float32)
        self.t_window = (int(t_window[0]), int(t_window[1]))
        self.tile_b = int(tile_b)
        assert self.tile_b > 0 and self.tile_b % 8 == 0
        self.vmem_limit_bytes = int(vmem_limit_bytes)
        self._precompute()
        self._forward_jit = jax.jit(self._forward)

    # ---- static index math (depends only on module parameters) -------------
    def _precompute(self):
        t = self.t
        T = self.pulse_width

        # decod_signal
        t_start = int(np.argmin(np.abs(t - 0.0)))
        t_end = self.t_window[1]
        t_dec = t[t_start:t_end]
        Td = t_dec.shape[0]
        start_pulse = int(np.argmin(np.abs(t_dec - 0.5 * T)))
        end_pulse = int(np.argmin(np.abs(t_dec - 1.5 * T)))
        w_pulse = end_pulse - start_pulse
        assert 0 < w_pulse < Td
        # Reference clamps the u window at min(t_end, Td); equivalence needs
        # Td = t_end - t_start <= t_end (t_start >= 0).
        assert Td <= t_end

        # decod_bit_seq
        n = self.pulse_number - 1
        assert n >= 1, "pulse_number must be >= 2"
        t_starts = (np.arange(n, dtype=np.float32) * T + 0.5 * T).reshape(n, 1)
        idx_starts = np.argmin(np.abs(t_dec[None, :] - t_starts),
                               axis=-1).astype(np.int64)
        # The PyTorch reference indexes idx_starts[1]; handle n == 1 explicitly
        # (single decoded bit: one pulse-period wide window).
        wp = int(idx_starts[1] - idx_starts[0]) if n > 1 else int(w_pulse)
        assert wp > 0
        assert int(idx_starts[-1]) + wp <= Td
        # Dropping the u-window mask in the kernel relies on G's rows below
        # start_pulse being all-zero, i.e. the first pulse window starts
        # exactly at start_pulse (same argmin over |t_dec - 0.5 T|).
        assert int(idx_starts[0]) == start_pulse

        # trapezoid quadrature weights over the first pulse's time grid
        idx_pulses0 = np.arange(wp) + int(idx_starts[0])
        t_pulses = t_dec[idx_pulses0]
        dx = np.diff(t_pulses).astype(np.float32)
        w = np.zeros(wp, np.float32)
        w[:-1] += 0.5 * dx
        w[1:] += 0.5 * dx

        # gather + trapz matrix: integ[:, k] = sum_j sd[:, idx_starts[k]+j]*w[j]
        # n_pad kept at 128 (lane-dense matmul output); round to 256 on
        # v6e/v7x only if pulse_number grows large.
        n_pad = max(_round_up(n, 128), 128)
        G = np.zeros((Td, n_pad), np.float32)
        for k in range(n):
            s0 = int(idx_starts[k])
            G[s0:s0 + wp, k] = w

        self.Td = Td                  # decoded time length (NOT lane-padded)
        self.n = n
        self.n_pad = n_pad
        self.start_pulse = start_pulse
        self.w_pulse = w_pulse
        self.t_start = t_start
        self.G = jnp.asarray(G)

    # ---- forward ------------------------------------------------------------
    def _forward(self, preds, targets):
        B = preds.shape[0]
        # Block second-minor dim must be a multiple of 8 OR the full array dim.
        tile_b = self.tile_b if B > self.tile_b else B
        num_tiles = pl.cdiv(B, tile_b)
        sl = slice(self.t_start, self.t_start + self.Td)

        # Four thin f32 planes (no stack, no pad).  With allow_input_fusion the
        # real/imag/slice/cast chain can fuse into the Pallas input reads.
        t_re = jnp.real(targets[:, sl]).astype(jnp.float32)
        t_im = jnp.imag(targets[:, sl]).astype(jnp.float32)
        p_re = jnp.real(preds[:, sl]).astype(jnp.float32)
        p_im = jnp.imag(preds[:, sl]).astype(jnp.float32)

        kernel = functools.partial(
            _ber_kernel,
            w_pulse=self.w_pulse,
            decision_level=self.decision_level,
            tile_b=tile_b,
            batch=B,
        )

        sig_spec = pl.BlockSpec((tile_b, self.Td), lambda i: (i, 0))
        flops = 4 * B * self.Td * self.n_pad + 12 * B * self.Td
        bytes_accessed = 4 * (4 * B * self.Td
                              + self.Td * self.n_pad
                              + num_tiles * self.n_pad)

        counts = pl.pallas_call(
            kernel,
            out_shape=jax.ShapeDtypeStruct((num_tiles, self.n_pad),
                                           jnp.float32),
            grid=(num_tiles,),
            in_specs=[
                sig_spec, sig_spec, sig_spec, sig_spec,
                # quadrature matrix: constant block index -> stays resident.
                pl.BlockSpec((self.Td, self.n_pad), lambda i: (0, 0)),
            ],
            # one independent lane-dense row per tile -> grid can be parallel
            out_specs=pl.BlockSpec((1, self.n_pad), lambda i: (i, 0)),
            compiler_params=pltpu.CompilerParams(
                dimension_semantics=("parallel",),
                vmem_limit_bytes=self.vmem_limit_bytes,
                allow_input_fusion=[True, True, True, True, False]),
            cost_estimate=pl.CostEstimate(
                flops=int(flops), transcendentals=0,
                bytes_accessed=int(bytes_accessed)),
        )(t_re, t_im, p_re, p_im, self.G)

        return jnp.sum(counts) / jnp.float32(B * self.n)

    def __call__(self, preds, targets):
        return self._forward_jit(preds, targets)


# ---- pure-JAX transliteration of the PyTorch forward (validation) -----------
def reference_ber(preds, targets, t, t_window, pulse_width, pulse_number,
                  decision_level):
    signal = jnp.stack([targets, preds], axis=1)  # [B, 2, dim_t]
    T = pulse_width
    t = jnp.asarray(t)
    t_start = int(jnp.argmin(jnp.abs(t - 0.0)))
    t_end = int(t_window[1])
    t_dec = t[t_start:t_end]
    sig = signal[:, :, t_start:t_end]
    Td = sig.shape[-1]
    start_pulse = int(jnp.argmin(jnp.abs(t_dec - 0.5 * T)))
    end_pulse = int(jnp.argmin(jnp.abs(t_dec - 1.5 * T)))
    w_pulse = end_pulse - start_pulse

    hi = min(t_end, Td)
    u = jnp.zeros_like(sig).at[:, :, start_pulse:hi].set(sig[:, :, start_pulse:hi])
    u_sh = jnp.zeros_like(u).at[:, :, start_pulse:Td - w_pulse].set(u[:, :, end_pulse:])
    dec = u + u_sh
    dec = (dec * jnp.conj(dec)).real

    n = pulse_number - 1
    t_starts = (jnp.arange(n) * T + 0.5 * T).reshape(n, 1)
    idx_starts = jnp.argmin(jnp.abs(t_dec[None, :] - t_starts), axis=-1)
    wp = int(idx_starts[1] - idx_starts[0]) if n > 1 else int(w_pulse)
    idx_pulses = jnp.arange(wp)[None, :] + idx_starts[:, None]  # [n, wp]
    pulses = dec[..., idx_pulses.reshape(-1)]
    pulses = pulses.reshape(*dec.shape[:-1], n, wp)
    t_pulses = t_dec[idx_pulses[0]]
    dx = jnp.diff(t_pulses)
    integ = jnp.sum(0.5 * (pulses[..., 1:] + pulses[..., :-1]) * dx, axis=-1)
    bits = (integ > decision_level).astype(jnp.int32)
    tgt = bits[:, 0, :]
    prd = bits[:, -1, :]
    return jnp.sum(tgt != prd) / tgt.size


if __name__ == "__main__":
    # Deterministic module parameters (synthetic, set in-script).
    B = 2
    dim_t = 513                     # odd -> t contains 0 exactly, dt = 0.125
    t = np.linspace(-32.0, 32.0, dim_t).astype(np.float32)
    pulse_width = 4.0
    pulse_number = 4                # -> n = 3 decoded bits per sequence
    decision_level = 15.0
    t_end = int(np.argmin(np.abs(t - 20.0)))
    t_window = (0, t_end)

    # Deterministic example inputs: complex signals [B, dim_t].
    key = jax.random.PRNGKey(0)
    k1, k2, k3, k4 = jax.random.split(key, 4)
    preds = (jax.random.normal(k1, (B, dim_t), jnp.float32)
             + 1j * jax.random.normal(k2, (B, dim_t), jnp.float32)).astype(jnp.complex64)
    targets = (jax.random.normal(k3, (B, dim_t), jnp.float32)
               + 1j * jax.random.normal(k4, (B, dim_t), jnp.float32)).astype(jnp.complex64)

    ber_est = BEREstimaterPallas(decision_level, pulse_number, pulse_width, t, t_window)
    ber = jax.block_until_ready(ber_est(preds, targets))

    ref = jax.block_until_ready(
        reference_ber(preds, targets, t, t_window, pulse_width, pulse_number,
                      decision_level))

    assert np.allclose(np.asarray(ber), np.asarray(ref), atol=1e-6), (ber, ref)
    print("KERNEL_OK")
</pallas_src>

<mosaic_0001>
module attributes {stable_mosaic.version = 11 : i64} {
  func.func @_ber_kernel(%arg0: i32, %arg1: memref<2x160xf32, #tpu.memory_space<vmem>>, %arg2: memref<2x160xf32, #tpu.memory_space<vmem>>, %arg3: memref<2x160xf32, #tpu.memory_space<vmem>>, %arg4: memref<2x160xf32, #tpu.memory_space<vmem>>, %arg5: memref<160x128xf32, #tpu.memory_space<vmem>>, %arg6: memref<1x128xf32, #tpu.memory_space<vmem>>) attributes {dimension_semantics = [#tpu.dimension_semantics<parallel>], iteration_bounds = array<i64: 1>, scalar_prefetch = 0 : i64, scratch_operands = 0 : i64, tpu.core_type = #tpu.core_type<tc>, window_params = [{transform_indices = @transform_0, window_bounds = array<i64: 2, 160>}, {transform_indices = @transform_1, window_bounds = array<i64: 2, 160>}, {transform_indices = @transform_2, window_bounds = array<i64: 2, 160>}, {transform_indices = @transform_3, window_bounds = array<i64: 2, 160>}, {pipeline_mode = #tpu.pipeline_mode<synchronous>, transform_indices = @transform_4, window_bounds = array<i64: 160, 128>}, {transform_indices = @transform_5, window_bounds = array<i64: 1, 128>}]} {
    %c0 = arith.constant 0 : index
    %c0_0 = arith.constant 0 : index
    %0 = vector.load %arg5[%c0, %c0_0] : memref<160x128xf32, #tpu.memory_space<vmem>>, vector<160x128xf32>
    %c0_1 = arith.constant 0 : index
    %c0_2 = arith.constant 0 : index
    %1 = vector.load %arg1[%c0_1, %c0_2] : memref<2x160xf32, #tpu.memory_space<vmem>>, vector<2x160xf32>
    %2 = vector.extract_strided_slice %1 {offsets = [0, 32], sizes = [2, 128], strides = [1, 1]} : vector<2x160xf32> to vector<2x128xf32>
    %cst = arith.constant 0.000000e+00 : f32
    %3 = vector.broadcast %cst : f32 to vector<2x32xf32>
    %4 = tpu.concatenate %2, %3 in 1 : vector<2x128xf32>, vector<2x32xf32> -> vector<2x160xf32>
    %5 = arith.addf %1, %4 : vector<2x160xf32>
    %c0_3 = arith.constant 0 : index
    %c0_4 = arith.constant 0 : index
    %6 = vector.load %arg2[%c0_3, %c0_4] : memref<2x160xf32, #tpu.memory_space<vmem>>, vector<2x160xf32>
    %7 = vector.extract_strided_slice %6 {offsets = [0, 32], sizes = [2, 128], strides = [1, 1]} : vector<2x160xf32> to vector<2x128xf32>
    %cst_5 = arith.constant 0.000000e+00 : f32
    %8 = vector.broadcast %cst_5 : f32 to vector<2x32xf32>
    %9 = tpu.concatenate %7, %8 in 1 : vector<2x128xf32>, vector<2x32xf32> -> vector<2x160xf32>
    %10 = arith.addf %6, %9 : vector<2x160xf32>
    %11 = arith.mulf %5, %5 : vector<2x160xf32>
    %12 = arith.mulf %10, %10 : vector<2x160xf32>
    %13 = arith.addf %11, %12 : vector<2x160xf32>
    %cst_6 = arith.constant dense<0.000000e+00> : vector<2x128xf32>
    %14 = tpu.matmul %13, %0, %cst_6 {dimension_numbers = #tpu.dot_dimension_numbers<[1], [0], [0], [1], [0, 0, 1, 1], [], []>} : vector<2x160xf32>, vector<160x128xf32>, vector<2x128xf32> -> vector<2x128xf32>
    %cst_7 = arith.constant 1.500000e+01 : f32
    %15 = vector.broadcast %cst_7 : f32 to vector<2x128xf32>
    %16 = arith.cmpf ogt, %14, %15 : vector<2x128xf32>
    %c0_8 = arith.constant 0 : index
    %c0_9 = arith.constant 0 : index
    %17 = vector.load %arg3[%c0_8, %c0_9] : memref<2x160xf32, #tpu.memory_space<vmem>>, vector<2x160xf32>
    %18 = vector.extract_strided_slice %17 {offsets = [0, 32], sizes = [2, 128], strides = [1, 1]} : vector<2x160xf32> to vector<2x128xf32>
    %cst_10 = arith.constant 0.000000e+00 : f32
    %19 = vector.broadcast %cst_10 : f32 to vector<2x32xf32>
    %20 = tpu.concatenate %18, %19 in 1 : vector<2x128xf32>, vector<2x32xf32> -> vector<2x160xf32>
    %21 = arith.addf %17, %20 : vector<2x160xf32>
    %c0_11 = arith.constant 0 : index
    %c0_12 = arith.constant 0 : index
    %22 = vector.load %arg4[%c0_11, %c0_12] : memref<2x160xf32, #tpu.memory_space<vmem>>, vector<2x160xf32>
    %23 = vector.extract_strided_slice %22 {offsets = [0, 32], sizes = [2, 128], strides = [1, 1]} : vector<2x160xf32> to vector<2x128xf32>
    %cst_13 = arith.constant 0.000000e+00 : f32
    %24 = vector.broadcast %cst_13 : f32 to vector<2x32xf32>
    %25 = tpu.concatenate %23, %24 in 1 : vector<2x128xf32>, vector<2x32xf32> -> vector<2x160xf32>
    %26 = arith.addf %22, %25 : vector<2x160xf32>
    %27 = arith.mulf %21, %21 : vector<2x160xf32>
    %28 = arith.mulf %26, %26 : vector<2x160xf32>
    %29 = arith.addf %27, %28 : vector<2x160xf32>
    %cst_14 = arith.constant dense<0.000000e+00> : vector<2x128xf32>
    %30 = tpu.matmul %29, %0, %cst_14 {dimension_numbers = #tpu.dot_dimension_numbers<[1], [0], [0], [1], [0, 0, 1, 1], [], []>} : vector<2x160xf32>, vector<160x128xf32>, vector<2x128xf32> -> vector<2x128xf32>
    %cst_15 = arith.constant 1.500000e+01 : f32
    %31 = vector.broadcast %cst_15 : f32 to vector<2x128xf32>
    %32 = arith.cmpf ogt, %30, %31 : vector<2x128xf32>
    %33 = arith.xori %16, %32 : vector<2x128xi1>
    %34 = arith.extui %33 : vector<2x128xi1> to vector<2x128xi32>
    %35 = arith.sitofp %34 : vector<2x128xi32> to vector<2x128xf32>
    %cst_16 = arith.constant dense<0.000000e+00> : vector<128xf32>
    %36 = vector.multi_reduction <add>, %35, %cst_16 [0] : vector<2x128xf32> to vector<128xf32>
    %37 = vector.shape_cast %36 : vector<128xf32> to vector<1x128xf32>
    %c0_17 = arith.constant 0 : index
    %c0_18 = arith.constant 0 : index
    %38 = vector.load %arg6[%c0_17, %c0_18] : memref<1x128xf32, #tpu.memory_space<vmem>>, vector<1x128xf32>
    tpu.vector_store %arg6[%c0_17, %c0_18], %37 {strides = array<i32>} : memref<1x128xf32, #tpu.memory_space<vmem>>, vector<1x128xf32>,
    return
  }
  func.func @transform_0(%arg0: i32) -> (i32, i32) {
    %c0_i32 = arith.constant 0 : i32
    %c0_i32_0 = arith.constant 0 : i32
    return %arg0, %c0_i32 : i32, i32
  }
  func.func @transform_1(%arg0: i32) -> (i32, i32) {
    %c0_i32 = arith.constant 0 : i32
    %c0_i32_0 = arith.constant 0 : i32
    return %arg0, %c0_i32 : i32, i32
  }
  func.func @transform_2(%arg0: i32) -> (i32, i32) {
    %c0_i32 = arith.constant 0 : i32
    %c0_i32_0 = arith.constant 0 : i32
    return %arg0, %c0_i32 : i32, i32
  }
  func.func @transform_3(%arg0: i32) -> (i32, i32) {
    %c0_i32 = arith.constant 0 : i32
    %c0_i32_0 = arith.constant 0 : i32
    return %arg0, %c0_i32 : i32, i32
  }
  func.func @transform_4(%arg0: i32) -> (i32, i32) {
    %c0_i32 = arith.constant 0 : i32
    %c0_i32_0 = arith.constant 0 : i32
    %c0_i32_1 = arith.constant 0 : i32
    return %c0_i32, %c0_i32_0 : i32, i32
  }
  func.func @transform_5(%arg0: i32) -> (i32, i32) {
    %c0_i32 = arith.constant 0 : i32
    %c0_i32_0 = arith.constant 0 : i32
    return %arg0, %c0_i32 : i32, i32
  }
}

</mosaic_0001>

<bundles_post_ra>
// kernel: custom-call.1
= control target key start
LH: loop header
LB: loop body
LE: loop exit
PB: predicated region body
PF: predicated region fallthrough
CT: control target
= control target key end

     0   :  { %s59_s0 = inlined_call_operand.hbm [shape: c64[2,513], index: 0, kind: input, shape index: {}]   ;;  %s60_s1 = inlined_call_operand.vmem [shape: f32[2,513], index: 1, kind: output, shape index: {}]  }
   0x1   :  { %s2_s8 = scalar_lea.hbm %s59_s0, 160 }
   0x2   :  { %3 = vsyncpa [#allocation0], 0  ;;  %s4_s11 = sshll.u32 %s60_s1, 4  ;;  %s34_s14 = scalar_lea.hbm %s59_s0, 320  ;;  %s5_s11 = int_to_ptr.vmem [resolvable:$true] %s4_s11 }
   0x3   :  { %p11_p0 = scmp.ne.s32.totalorder %s2_s8, %s34_s14  ;;  %p13_p1 = scmp.lt.u32.totalorder %s2_s8, %s59_s0 }
   0x4   :  { %p14_p2 = scmp.lt.u32.totalorder %s34_s14, %s34_s14  ;;  %p16_p4 = scmp.lt.u32.totalorder %s34_s14, %s2_s8 }
   0x6   :  { %p15_p3 = por %p14_p2, %p13_p1 }
   0x8   :  { %p17_p5 = por %p16_p4, %p15_p3 }
   0xa   :  { %p18_p6 = pnand %p17_p5, %p11_p0 }
   0xc   :  { %21 = shalt.err (!%p18_p6)  }
   0xd   :  { %s22_s17 = scalar_lea.vmem %s5_s11, 160  ;;  %p27_p8 = scmp.lt.s32.totalorder %s5_s11, %s5_s11 }
   0xe   :  { %p23_p7 = scmp.ne.s32.totalorder %s5_s11, %s22_s17  ;;  %p28_p9 = scmp.lt.s32.totalorder %s22_s17, %s22_s17 }
  0x10   :  { %p29_p10 = por %p28_p9, %p27_p8 }
  0x12   :  { %p30_p11 = pnand %p29_p10, %p23_p7 }
  0x14   :  { %33 = shalt.err (!%p30_p11)  }
  0x15   :  { %7 = dma.hbm_to_vmem [thread:$0]  %s2_s8, 160, %s5_s11, [#allocation0] }
  0x16   :  { %35 = dma.done.wait [#allocation0], 160  }
  0x17   :  { %36 = vsyncadd [#allocation0], 4294967136 }
  0x18   :  { %9 = vsyncpa [#allocation0], 1 }

// kernel: custom-call
= control target key start
LH: loop header
LB: loop body
LE: loop exit
PB: predicated region body
PF: predicated region fallthrough
CT: control target
= control target key end

     0   :  { %2 = vsyncpa [#allocation0], 0  ;;  %s61_s0 = inlined_call_operand.hbm [shape: c64[2,513], index: 0, kind: input, shape index: {}]   ;;  %s62_s1 = inlined_call_operand.vmem [shape: f32[2,513], index: 1, kind: output, shape index: {}]  }
   0x1   :  { %s3_s8 = sshll.u32 %s62_s1, 4  ;;  %s9_s11 = scalar_lea.hbm %s61_s0, 160  ;;  %s4_s8 = int_to_ptr.vmem [resolvable:$true] %s3_s8 }
   0x2   :  { %p10_p0 = scmp.ne.s32.totalorder %s61_s0, %s9_s11  ;;  %s11_s16 = scalar_lea.hbm %s61_s0, 320 }
   0x3   :  { %p12_p1 = scmp.lt.u32.totalorder %s11_s16, %s9_s11  ;;  %p13_p2 = scmp.lt.u32.totalorder %s9_s11, %s61_s0 }
   0x5   :  { %p14_p3 = por %p13_p2, %p12_p1 }
   0x7   :  { %p15_p4 = pnand %p14_p3, %p10_p0 }
   0x9   :  { %18 = shalt.err (!%p15_p4)  }
   0xa   :  { %s19_s1 = scalar_lea.vmem %s4_s8, 160  ;;  %p24_p6 = scmp.lt.s32.totalorder %s4_s8, %s4_s8 }
   0xb   :  { %p20_p5 = scmp.ne.s32.totalorder %s4_s8, %s19_s1  ;;  %p25_p7 = scmp.lt.s32.totalorder %s19_s1, %s19_s1 }
   0xd   :  { %p26_p8 = por %p25_p7, %p24_p6 }
   0xf   :  { %p27_p9 = pnand %p26_p8, %p20_p5 }
  0x11   :  { %30 = shalt.err (!%p27_p9)  }
  0x12   :  { %6 = dma.hbm_to_vmem [thread:$0]  %s61_s0, 160, %s4_s8, [#allocation0] }
  0x13   :  { %31 = dma.done.wait [#allocation0], 160  }
  0x14   :  { %32 = vsyncadd [#allocation0], 4294967136 }
  0x15   :  { %8 = vsyncpa [#allocation0], 1 }

// kernel: _forward.2
= control target key start
LH: loop header
LB: loop body
LE: loop exit
PB: predicated region body
PF: predicated region fallthrough
CT: control target
= control target key end

     0   :  { %10 = vsyncpa [#allocation23], 0  ;;  %s496_s18 = smov [#allocation22]   ;;  %s620_s0 = inlined_call_operand.hbm [shape: f32[160,128], index: 0, kind: input, shape index: {}]   ;;  %s621_s1 = inlined_call_operand.vmem [shape: f32[2,513], index: 1, kind: input, shape index: {}]   ;;  %s622_s2 = inlined_call_operand.vmem [shape: f32[2,513], index: 2, kind: input, shape index: {}]   ;;  %s623_s3 = inlined_call_operand.vmem [shape: f32[2,513], index: 3, kind: input, shape index: {}]   ;;  %s624_s4 = inlined_call_operand.vmem [shape: f32[2,513], index: 4, kind: input, shape index: {}]   ;;  %s625_s5 = inlined_call_operand.vmem [shape: f32[1,128], index: 5, kind: output, shape index: {}]  }
   0x1   :  { %s28_s19 = sshll.u32 %s496_s18, 4  ;;  %s472_s22 = scalar_lea.hbm %s620_s0, 2560  ;;  %s29_s19 = int_to_ptr.vmem [resolvable:$true] %s28_s19 }
   0x2   :  { %p473_p0 = scmp.ne.s32.totalorder %s620_s0, %s472_s22  ;;  %p476_p1 = scmp.lt.u32.totalorder %s472_s22, %s620_s0 }
   0x4   :  { %p478_p2 = pnand %p476_p1, %p473_p0 }
   0x6   :  { %481 = shalt.err (!%p478_p2)
}
   0x7   :  { %s482_s27 = scalar_lea.vmem %s29_s19, 2560  ;;  %p487_p4 = scmp.lt.s32.totalorder %s29_s19, %s29_s19 }
   0x8   :  { %p483_p3 = scmp.ne.s32.totalorder %s29_s19, %s482_s27  ;;  %p488_p5 = scmp.lt.s32.totalorder %s482_s27, %s482_s27 }
   0xa   :  { %p489_p6 = por %p488_p5, %p487_p4 }
   0xc   :  { %p490_p7 = pnand %p489_p6, %p483_p3 }
   0xe   :  { %493 = shalt.err (!%p490_p7)
}
   0xf   :  { %s497_s28 = smov 128   ;;  %s498_s29 = smov 8  }
  0x10   :  { %34 = dma.hbm_to_vmem [thread:$0]  %s620_s0, 2560, %s29_s19, [#allocation23], %s497_s28, %s497_s28, %s498_s29  }
  0x11   :  { %494 = dma.done.wait [#allocation23], 2560  }
  0x12   :  { %495 = vsyncadd [#allocation23], 4294964736  ;;  %v499_v0 = vmov 0.0|0.0   ;;  %v500_v1 = vmov 1983009808   ;;  %v103_v3 = vlaneseq  ;;  %v78_v10 = vld [vmem:[#allocation22] sm:$0xff] }
  0x13   :  { %405 = vmatprep.subr.bf16.mxu0 %v499_v0  ;;  %435 = vmatprep.subr.bf16.mxu1 %v499_v0  ;;  %v101_v2 = vunpack.c.l.s4 %v500_v1  ;;  %v396_v4 = vld [vmem:[%s623_s3 + $0x4] sm:$0xf]   ;;  %v79_v11 = vld [vmem:[#allocation22 + $0x8] sm:$0xff]  ;;  %v80_v13 = vld [vmem:[#allocation22 + $0x10] sm:$0xff]  ;;  %vm112_vm0 = vcmask 785408   ;;  %v502_v58 = vmov 0.0  }
  0x14   :  { %v394_v5 = vld [vmem:[%s624_s4 + $0x4] sm:$0xf]   ;;  %56 = vst [vmem:[#allocation25] sm:$0xf] %v396_v4   ;;  %v104_v8 = vshrl.u32 %v103_v3, 7  ;;  %v406_v12 = vpack.c.bf16 %v79_v11, %v78_v10  ;;  %v81_v14 = vld [vmem:[#allocation22 + $0x18] sm:$0xff] }
  0x15   :  { %v398_v6 = vld [vmem:[%s622_s2 + $0x4] sm:$0xf]   ;;  %v102_v7 = vunpack.c.0.s8 %v101_v2  ;;  %48 = vst [vmem:[#allocation24] sm:$0xf] %v394_v5   ;;  %v409_v15 = vpack.c.bf16 %v81_v14, %v80_v13  ;;  %v83_v18 = vld [vmem:[#allocation22 + $0x28] sm:$0xff]  ;;  %v84_v25 = vld [vmem:[#allocation22 + $0x30] sm:$0xff] }
  0x16   :  { %64 = vst [vmem:[#allocation26] sm:$0xf] %v398_v6   ;;  %v400_v9 = vld [vmem:[%s621_s1 + $0x4] sm:$0xf]   ;;  %407 = vmatpush1.bf16.msra.mxu0 %v406_v12  ;;  %437 = vmatpush1.bf16.msra.mxu1 %v406_v12  ;;  %v85_v26 = vld [vmem:[#allocation22 + $0x38] sm:$0xff]  ;;  %s501_s1 = smov 96  }
  0x17   :  { %72 = vst [vmem:[#allocation27] sm:$0xf] %v400_v9   ;;  %v559_v16 = vsub.s32 %v102_v7, %v104_v8  ;;  %408 = vmatprep.subr.bf16.mxu0 %v499_v0  ;;  %438 = vmatprep.subr.bf16.mxu1 %v499_v0  ;;  %v82_v17 = vld [vmem:[#allocation22 + $0x20] sm:$0xff]  ;;  %v415_v30 = vpack.c.bf16 %v85_v26, %v84_v25  ;;  %v87_v32 = vld [vmem:[#allocation22 + $0x48] sm:$0xff]  ;;  %v88_v37 = vld [vmem:[#allocation22 + $0x50] sm:$0xff]  ;;  %vm163_vm1 = vcmask 261120  }
  0x18   :  { %v412_v22 = vpack.c.bf16 %v83_v18, %v82_v17  ;;  %v86_v31 = vld [vmem:[#allocation22 + $0x40] sm:$0xff]  ;;  %v89_v38 = vld [vmem:[#allocation22 + $0x58] sm:$0xff]  ;;  %v91_v42 = vld [vmem:[#allocation22 + $0x68] sm:$0xff]  ;;  %vm376_vm4 = vcmask 1041408  }
  0x19   :  { %v418_v36 = vpack.c.bf16 %v87_v32, %v86_v31  ;;  %v421_v40 = vpack.c.bf16 %v89_v38, %v88_v37  ;;  %v90_v41 = vld [vmem:[#allocation22 + $0x60] sm:$0xff]  ;;  %v92_v44 = vld [vmem:[#allocation22 + $0x70] sm:$0xff]  ;;  %v93_v45 = vld [vmem:[#allocation22 + $0x78] sm:$0xff] }
  0x1a   :  { %410 = vmatpush1.bf16.msra.mxu0 %v409_v15  ;;  %440 = vmatpush1.bf16.msra.mxu1 %v409_v15  ;;  %v424_v43 = vpack.c.bf16 %v91_v42, %v90_v41  ;;  %v427_v46 = vpack.c.bf16 %v93_v45, %v92_v44  ;;  %v94_v47 = vld [vmem:[#allocation22 + $0x80] sm:$0xff]  ;;  %v95_v48 = vld [vmem:[#allocation22 + $0x88] sm:$0xff]  ;;  %v96_v50 = vld [vmem:[#allocation22 + $0x90] sm:$0xff] }
  0x1b   :  { %v563_v19 = vld [vmem:[#allocation25] sm:$0xf]  ;;  %411 = vmatprep.subr.bf16.mxu0 %v499_v0  ;;  %441 = vmatprep.subr.bf16.mxu1 %v499_v0  ;;  %v430_v49 = vpack.c.bf16 %v95_v48, %v94_v47  ;;  %v97_v51 = vld [vmem:[#allocation22 + $0x98] sm:$0xff] }
  0x1c   :  { %v565_v20 = vld [vmem:[#allocation24] sm:$0xf]  ;;  %v133_v23 = vrot.slane %v563_v19, %v559_v16  ;;  %v433_v52 = vpack.c.bf16 %v97_v51, %v96_v50 }
  0x1d   :  { %v567_v21 = vld [vmem:[#allocation26] sm:$0xf]  ;;  %v106_v24 = vrot.slane %v565_v20, %v559_v16 }
  0x1e   :  { %135 = vrot.lane.b32.xlu1 %v133_v23, %s501_s1  ;;  %v134_v27 = vcombine.high %v133_v23, %v133_v23  ;;  %v245_v28 = vrot.slane %v567_v21, %v559_v16  ;;  %v579_v29 = vld [vmem:[#allocation27] sm:$0xf]  ;;  %413 = vmatpush1.bf16.msra.mxu0 %v412_v22 }
  0x1f   :  { %108 = vrot.lane.b32.xlu0 %v106_v24, %s501_s1  ;;  %443 = vmatpush1.bf16.msra.mxu1 %v412_v22  ;;  %v107_v33 = vcombine.high %v106_v24, %v106_v24  ;;  %v270_v35 = vrot.slane %v579_v29, %v559_v16 }
  0x20   :  { %414 = vmatprep.subr.bf16.mxu0 %v499_v0  ;;  %444 = vmatprep.subr.bf16.mxu1 %v499_v0  ;;  %v246_v34 = vcombine.high %v245_v28, %v245_v28 }
  0x21   :  { %v271_v39 = vcombine.high %v270_v35, %v270_v35 }
  0x22   :  { %137 = vrot.lane.b32.xlu1 %v134_v27, %s501_s1  ;;  %416 = vmatpush1.bf16.msra.mxu0 %v415_v30 }
  0x23   :  { %247 = vrot.lane.b32.xlu0 %v245_v28, %s501_s1  ;;  %446 = vmatpush1.bf16.msra.mxu1 %v415_v30 }
  0x24   :  { %417 = vmatprep.subr.bf16.mxu0 %v499_v0  ;;  %447 = vmatprep.subr.bf16.mxu1 %v499_v0 }
  0x26   :  { %249 = vrot.lane.b32.xlu1 %v246_v34, %s501_s1  ;;  %419 = vmatpush1.bf16.msra.mxu0 %v418_v36 }
  0x27   :  { %110 = vrot.lane.b32.xlu0 %v107_v33, %s501_s1  ;;  %449 = vmatpush1.bf16.msra.mxu1 %v418_v36 }
  0x28   :  { %420 = vmatprep.subr.bf16.mxu0 %v499_v0  ;;  %450 = vmatprep.subr.bf16.mxu1 %v499_v0 }
  0x2a   :  { %274 = vrot.lane.b32.xlu1 %v271_v39, %s501_s1  ;;  %422 = vmatpush1.bf16.msra.mxu0 %v421_v40 }
  0x2b   :  { %272 = vrot.lane.b32.xlu0 %v270_v35, %s501_s1  ;;  %452 = vmatpush1.bf16.msra.mxu1 %v421_v40 }
  0x2c   :  { %423 = vmatprep.subr.bf16.mxu0 %v499_v0  ;;  %453 = vmatprep.subr.bf16.mxu1 %v499_v0 }
  0x2e   :  { %425 = vmatpush1.bf16.msra.mxu0 %v424_v43 }
  0x2f   :  { %455 = vmatpush1.bf16.msra.mxu1 %v424_v43  ;;  %426 = vmatprep.subr.bf16.mxu0 %v499_v0 }
  0x30   :  { %456 = vmatprep.subr.bf16.mxu1 %v499_v0 }
  0x32   :  { %428 = vmatpush1.bf16.msra.mxu0 %v427_v46 }
  0x33   :  { %458 = vmatpush1.bf16.msra.mxu1 %v427_v46  ;;  %429 = vmatprep.subr.bf16.mxu0 %v499_v0 }
  0x34   :  { %459 = vmatprep.subr.bf16.mxu1 %v499_v0 }
  0x36   :  { %431 = vmatpush1.bf16.msra.mxu0 %v430_v49 }
  0x37   :  { %461 = vmatpush1.bf16.msra.mxu1 %v430_v49  ;;  %432 = vmatprep.subr.bf16.mxu0 %v499_v0 }
  0x38   :  { %462 = vmatprep.subr.bf16.mxu1 %v499_v0 }
  0x3a   :  { %434 = vmatpush1.bf16.msra.mxu0 %v433_v52 }
  0x3b   :  { %464 = vmatpush1.bf16.msra.mxu1 %v433_v52 }
  0x90   :  { %v136_v53 = vpop.permute.xlu1 %135 }
  0x91   :  { %v109_v54 = vpop.permute.xlu0 %108 }
  0x94   :  { %v138_v55 = vpop.permute.xlu1 %137 }
  0x95   :  { %v248_v56 = vpop.permute.xlu0 %247  ;;  %v139_v57 = vsel %vm112_vm0, %v136_v53, %v138_v55 }
  0x96   :  { %v140_v59 = vcombine.low %v139_v57, %v502_v58 }
  0x98   :  { %v147_v60 = vrot.slane %v140_v59, %v559_v16  ;;  %v250_v61 = vpop.permute.xlu1 %249 }
  0x99   :  { %v111_v62 = vpop.permute.xlu0 %110  ;;  %v251_v63 = vsel %vm112_vm0, %v248_v56, %v250_v61 }
  0x9a   :  { %v113_v1 = vsel %vm112_vm0, %v109_v54, %v111_v62  ;;  %v252_v0 = vcombine.low %v251_v63, %v502_v58  ;;  %v149_v3 = vadd.f32 %v147_v60, %v563_v19 }
  0x9b   :  { %v115_v2 = vcombine.low %v113_v1, %v502_v58 }
  0x9c   :  { %v259_v4 = vrot.slane %v252_v0, %v559_v16  ;;  %v275_v6 = vpop.permute.xlu1 %274  ;;  %v151_v11 = vmul.f32 %v149_v3, %v149_v3 }
  0x9d   :  { %v122_v5 = vrot.slane %v115_v2, %v559_v16  ;;  %v273_v7 = vpop.permute.xlu0 %272 }
  0x9e   :  { %v276_v8 = vsel %vm112_vm0, %v273_v7, %v275_v6  ;;  %v261_v12 = vadd.f32 %v259_v4, %v567_v21 }
  0x9f   :  { %v124_v9 = vadd.f32 %v122_v5, %v565_v20  ;;  %v277_v10 = vcombine.low %v276_v8, %v502_v58 }
  0xa0   :  { %v287_v18 = vmul.f32 %v261_v12, %v261_v12 }
  0xa1   :  { %v150_v13 = vmul.f32 %v124_v9, %v124_v9  ;;  %v284_v14 = vrot.slane %v277_v10, %v559_v16 }
  0xa3   :  { %v286_v15 = vadd.f32 %v284_v14, %v579_v29  ;;  %v152_v17 = vadd.f32 %v151_v11, %v150_v13 }
  0xa5   :  { %v288_v19 = vmul.f32 %v286_v15, %v286_v15  ;;  %v160_v22 = vrot.slane %v152_v17, %v559_v16 }
  0xa7   :  { %v161_v23 = vcombine.high %v160_v22, %v160_v22  ;;  %v289_v24 = vadd.f32 %v288_v19, %v287_v18 }
  0xa9   :  { %402 = vmatprep.mubr.msk.f32.mxu0 %vm163_vm1, %v161_v23  ;;  %v297_v20 = vrot.slane %v289_v24, %v559_v16 }
  0xaa   :  { %231 = vmatmul.mubr.f32.vlgmr.msra.gmra.mrb[0].mxu0 %v160_v22 }
  0xab   :  { %v298_v25 = vcombine.high %v297_v20, %v297_v20 }
  0xad   :  { %403 = vmatprep.mubr.msk.f32.mxu1 %vm163_vm1, %v298_v25 }
  0xae   :  { %367 = vmatmul.mubr.f32.vlgmr.msra.gmra.mrb[0].mxu1 %v297_v20 }
 0x17d   :  { %v232_v21 = vpop.f32.mrb[0].mxu0 }
 0x17e   :  { %v234_v26 = vpop.f32.mrb[1].mxu0  ;;  %vm236_vm2 = vcmp.gt.f32.partialorder %v232_v21, 15.0 }
 0x181   :  { %v368_v27 = vpop.f32.mrb[0].mxu1 }
 0x182   :  { %vm372_vm3 = vcmp.gt.f32.partialorder %v368_v27, 15.0  ;;  %v370_v28 = vpop.f32.mrb[1].mxu1 }
 0x183   :  { %vm373_vm5 = vmxor %vm236_vm2, %vm372_vm3 }
 0x184   :  { %v404_v29 = vsel %vm373_vm5, 1.0, %v502_v58 }
 0x185   :  { %v377_v30 = vsel %vm376_vm4, %v404_v29, 0.0 }
 0x186   :  { %v378_v31 = vrot.slane %v377_v30, 4 }
 0x188   :  { %v379_v32 = vadd.f32 %v378_v31, %v377_v30 }
 0x18a   :  { %v380_v33 = vrot.slane %v379_v32, 2 }
 0x18c   :  { %v381_v34 = vadd.f32 %v380_v33, %v379_v32 }
 0x18e   :  { %v382_v35 = vrot.slane %v381_v34, 1 }
 0x190   :  { %v383_v16 = vadd.f32 %v382_v35, %v381_v34 }
 0x192   :  { %384 = vst [vmem:[%s625_s5] sm:$0x1] %v383_v16 }
 0x193   :  { %389 = vsyncpa [#allocation23], 1 }

</bundles_post_ra>
